<compile_context>
chip_gen: v7x
topology: tpu7x:2x2x1
jax: 0.10.0
libtpu: 0.0.40
codegen_flags: <defaults>
</compile_context>

<pallas_src>
import functools

import jax
import jax.numpy as jnp
from jax.experimental import pallas as pl
from jax.experimental.pallas import tpu as pltpu


HIDDEN = 16  # self.hidden_dim in the PyTorch module


def _alpha_relu(x, alpha=1.0):
    # torch.where(x > 0, alpha * x, zeros); alpha=1.0 -> ReLU
    return jnp.where(x > 0, alpha * x, jnp.zeros_like(x))


def _round_up(n, m):
    return ((n + m - 1) // m) * m


def mlp_kernel(xt_ref, w1_ref, b1_ref, w2_ref, b2_ref, w3_ref, b3_ref, o_ref):
    """One grid step processes a (D, TB) feature-major tile of the batch.

    All activations are (H, TB): H=16 on the sublane axis, batch dense on the
    lane axis.  Weights/biases use constant index_maps so they stay resident.
    """
    xt = xt_ref[...]                                   # (D, TB) float32

    # fc1: (H, D) @ (D, TB) -> (H, TB)
    h = jnp.dot(w1_ref[...], xt, preferred_element_type=jnp.float32)
    h = _alpha_relu(h + jnp.broadcast_to(b1_ref[...], h.shape))
    # dropout(p=0.3) -> identity at inference

    # fc2 applied three times with the same weights, as in the PyTorch forward.
    w2 = w2_ref[...]                                   # (H, H)
    b2b = jnp.broadcast_to(b2_ref[...], h.shape)       # hoisted: one broadcast
    for _ in range(3):
        h = jnp.dot(w2, h, preferred_element_type=jnp.float32) + b2b
        h = _alpha_relu(h)
        # dropout -> identity (inference)

    # fc3: (1, H) @ (H, TB) -> (1, TB), already lane-dense; no transpose needed.
    z = jnp.dot(w3_ref[...], h, preferred_element_type=jnp.float32)
    z = z + b3_ref[0, 0]                               # scalar bias from SMEM
    o_ref[...] = jax.nn.sigmoid(z)                     # dense (1, TB) store


@functools.partial(jax.jit, static_argnames=("block_rows",))
def complex_nn_1_forward(x, params, block_rows=8192):
    """x: (B, input_dim) float32. Returns sigmoid outputs of shape (B, 1)."""
    B, D = x.shape
    H = HIDDEN

    # Feature-major view of x for lane-dense batch tiles.  (Callers that
    # already hold feature-major data can pass x.T-shaped data and skip this.)
    xt = jnp.transpose(x)                              # (D, B)

    # Tile selection: small batches get a single full-extent tile; large
    # batches get >=2 lane-aligned tiles (megacore on v7x), capped by
    # block_rows so VMEM stays small on every generation (v5e/v6e/v7x).
    if B <= 256:
        TB = B
    else:
        TB = min(_round_up(int(block_rows), 128), _round_up(-(-B // 2), 128))
        TB = max(TB, 128)
    n_tiles = pl.cdiv(B, TB)                           # last tile may be partial

    # Parameters in native PyTorch nn.Linear layout: weight = (out, in).
    w1 = params["w1"]                                  # (H, D)
    b1 = params["b1"].reshape(H, 1)
    w2 = params["w2"]                                  # (H, H)
    b2 = params["b2"].reshape(H, 1)
    w3 = params["w3"].reshape(1, H)                    # (1, H)
    b3 = params["b3"].reshape(1, 1)                    # scalar -> SMEM

    out = pl.pallas_call(
        mlp_kernel,
        out_shape=jax.ShapeDtypeStruct((1, B), jnp.float32),
        grid=(n_tiles,),
        in_specs=[
            pl.BlockSpec((D, TB), lambda i: (0, i)),            # x^T batch tiles
            pl.BlockSpec((H, D), lambda i: (0, 0)),             # w1 (resident)
            pl.BlockSpec((H, 1), lambda i: (0, 0)),             # b1
            pl.BlockSpec((H, H), lambda i: (0, 0)),             # w2
            pl.BlockSpec((H, 1), lambda i: (0, 0)),             # b2
            pl.BlockSpec((1, H), lambda i: (0, 0)),             # w3
            pl.BlockSpec(memory_space=pltpu.MemorySpace.SMEM),  # b3 scalar (1, 1)
        ],
        out_specs=pl.BlockSpec((1, TB), lambda i: (0, i)),      # lane-dense output
        compiler_params=pltpu.CompilerParams(
            dimension_semantics=("parallel",)),
    )(xt, w1, b1, w2, b2, w3, b3)

    # Restore the PyTorch (B, 1) shape.
    return out.reshape(B, 1)


def init_params(key, input_dim, hidden=HIDDEN):
    """Deterministic synthetic init matching nn.Linear shapes (PyTorch layout)."""
    k1, k2, k3, k4, k5, k6 = jax.random.split(key, 6)

    def uinit(k, shape, fan_in):
        bound = 1.0 / jnp.sqrt(fan_in)
        return jax.random.uniform(k, shape, jnp.float32, -bound, bound)

    return {
        "w1": uinit(k1, (hidden, input_dim), input_dim),   # fc1.weight (out, in)
        "b1": uinit(k2, (hidden,), input_dim),
        "w2": uinit(k3, (hidden, hidden), hidden),         # fc2.weight
        "b2": uinit(k4, (hidden,), hidden),
        "w3": uinit(k5, (1, hidden), hidden),              # fc3.weight
        "b3": uinit(k6, (1,), hidden),
    }


def reference_forward(x, params):
    """Pure-JAX reference of the same forward pass (full float32)."""
    hp = jax.lax.Precision.HIGHEST
    h = _alpha_relu(jnp.dot(x, params["w1"].T, precision=hp) + params["b1"])
    for _ in range(3):
        h = _alpha_relu(jnp.dot(h, params["w2"].T, precision=hp) + params["b2"])
    z = jnp.dot(h, params["w3"].T, precision=hp) + params["b3"]
    return jax.nn.sigmoid(z)


if __name__ == "__main__":
    key = jax.random.PRNGKey(0)
    k_x, k_p, k_x2 = jax.random.split(key, 3)

    batch, input_dim = 8, 32
    params = init_params(k_p, input_dim)

    # Small single-tile case.
    x = jax.random.normal(k_x, (batch, input_dim), dtype=jnp.float32)
    out = jax.block_until_ready(complex_nn_1_forward(x, params))
    ref = reference_forward(x, params)
    assert out.shape == (batch, 1)
    assert jnp.allclose(out, ref, atol=1e-4, rtol=1e-4), "mismatch vs reference"

    # Multi-tile case with a partial last tile (no padding pass in the wrapper).
    x2 = jax.random.normal(k_x2, (300, input_dim), dtype=jnp.float32)
    out2 = jax.block_until_ready(complex_nn_1_forward(x2, params, block_rows=128))
    ref2 = reference_forward(x2, params)
    assert out2.shape == (300, 1)
    assert jnp.allclose(out2, ref2, atol=1e-4, rtol=1e-4), "mismatch vs reference (tiled)"

    print("KERNEL_OK")
</pallas_src>

<mosaic_0001>
module attributes {stable_mosaic.version = 11 : i64} {
  func.func @mlp_kernel(%arg0: i32, %arg1: memref<32x8xf32, #tpu.memory_space<vmem>>, %arg2: memref<16x32xf32, #tpu.memory_space<vmem>>, %arg3: memref<16x1xf32, #tpu.memory_space<vmem>>, %arg4: memref<16x16xf32, #tpu.memory_space<vmem>>, %arg5: memref<16x1xf32, #tpu.memory_space<vmem>>, %arg6: memref<1x16xf32, #tpu.memory_space<vmem>>, %arg7: memref<1x1xf32, #tpu.memory_space<smem>>, %arg8: memref<1x8xf32, #tpu.memory_space<vmem>>) attributes {dimension_semantics = [#tpu.dimension_semantics<parallel>], iteration_bounds = array<i64: 1>, scalar_prefetch = 0 : i64, scratch_operands = 0 : i64, tpu.core_type = #tpu.core_type<tc>, window_params = [{transform_indices = @transform_0, window_bounds = array<i64: 32, 8>}, {pipeline_mode = #tpu.pipeline_mode<synchronous>, transform_indices = @transform_1, window_bounds = array<i64: 16, 32>}, {pipeline_mode = #tpu.pipeline_mode<synchronous>, transform_indices = @transform_2, window_bounds = array<i64: 16, 1>}, {pipeline_mode = #tpu.pipeline_mode<synchronous>, transform_indices = @transform_3, window_bounds = array<i64: 16, 16>}, {pipeline_mode = #tpu.pipeline_mode<synchronous>, transform_indices = @transform_4, window_bounds = array<i64: 16, 1>}, {pipeline_mode = #tpu.pipeline_mode<synchronous>, transform_indices = @transform_5, window_bounds = array<i64: 1, 16>}, {transform_indices = @transform_6, window_bounds = array<i64: 1, 1>}, {transform_indices = @transform_7, window_bounds = array<i64: 1, 8>}]} {
    %c0 = arith.constant 0 : index
    %c0_0 = arith.constant 0 : index
    %0 = vector.load %arg1[%c0, %c0_0] : memref<32x8xf32, #tpu.memory_space<vmem>>, vector<32x8xf32>
    %c0_1 = arith.constant 0 : index
    %c0_2 = arith.constant 0 : index
    %1 = vector.load %arg2[%c0_1, %c0_2] : memref<16x32xf32, #tpu.memory_space<vmem>>, vector<16x32xf32>
    %cst = arith.constant dense<0.000000e+00> : vector<16x8xf32>
    %2 = tpu.matmul %1, %0, %cst {dimension_numbers = #tpu.dot_dimension_numbers<[1], [0], [0], [1], [0, 0, 1, 1], [], []>} : vector<16x32xf32>, vector<32x8xf32>, vector<16x8xf32> -> vector<16x8xf32>
    %c0_3 = arith.constant 0 : index
    %c0_4 = arith.constant 0 : index
    %3 = vector.load %arg3[%c0_3, %c0_4] : memref<16x1xf32, #tpu.memory_space<vmem>>, vector<16x1xf32>
    %4 = vector.shape_cast %3 : vector<16x1xf32> to vector<16x1xf32>
    %5 = vector.broadcast %4 : vector<16x1xf32> to vector<16x8xf32>
    %6 = arith.addf %2, %5 : vector<16x8xf32>
    %cst_5 = arith.constant 0.000000e+00 : f32
    %7 = vector.broadcast %cst_5 : f32 to vector<16x8xf32>
    %8 = arith.cmpf ogt, %6, %7 : vector<16x8xf32>
    %cst_6 = arith.constant 1.000000e+00 : f32
    %9 = vector.broadcast %cst_6 : f32 to vector<16x8xf32>
    %10 = arith.mulf %9, %6 : vector<16x8xf32>
    %cst_7 = arith.constant 0.000000e+00 : f32
    %11 = vector.broadcast %cst_7 : f32 to vector<16x8xf32>
    %12 = arith.select %8, %10, %11 : vector<16x8xi1>, vector<16x8xf32>
    %c0_8 = arith.constant 0 : index
    %c0_9 = arith.constant 0 : index
    %13 = vector.load %arg4[%c0_8, %c0_9] : memref<16x16xf32, #tpu.memory_space<vmem>>, vector<16x16xf32>
    %c0_10 = arith.constant 0 : index
    %c0_11 = arith.constant 0 : index
    %14 = vector.load %arg5[%c0_10, %c0_11] : memref<16x1xf32, #tpu.memory_space<vmem>>, vector<16x1xf32>
    %15 = vector.shape_cast %14 : vector<16x1xf32> to vector<16x1xf32>
    %16 = vector.broadcast %15 : vector<16x1xf32> to vector<16x8xf32>
    %cst_12 = arith.constant dense<0.000000e+00> : vector<16x8xf32>
    %17 = tpu.matmul %13, %12, %cst_12 {dimension_numbers = #tpu.dot_dimension_numbers<[1], [0], [0], [1], [0, 0, 1, 1], [], []>} : vector<16x16xf32>, vector<16x8xf32>, vector<16x8xf32> -> vector<16x8xf32>
    %18 = arith.addf %17, %16 : vector<16x8xf32>
    %cst_13 = arith.constant 0.000000e+00 : f32
    %19 = vector.broadcast %cst_13 : f32 to vector<16x8xf32>
    %20 = arith.cmpf ogt, %18, %19 : vector<16x8xf32>
    %cst_14 = arith.constant 1.000000e+00 : f32
    %21 = vector.broadcast %cst_14 : f32 to vector<16x8xf32>
    %22 = arith.mulf %21, %18 : vector<16x8xf32>
    %cst_15 = arith.constant 0.000000e+00 : f32
    %23 = vector.broadcast %cst_15 : f32 to vector<16x8xf32>
    %24 = arith.select %20, %22, %23 : vector<16x8xi1>, vector<16x8xf32>
    %cst_16 = arith.constant dense<0.000000e+00> : vector<16x8xf32>
    %25 = tpu.matmul %13, %24, %cst_16 {dimension_numbers = #tpu.dot_dimension_numbers<[1], [0], [0], [1], [0, 0, 1, 1], [], []>} : vector<16x16xf32>, vector<16x8xf32>, vector<16x8xf32> -> vector<16x8xf32>
    %26 = arith.addf %25, %16 : vector<16x8xf32>
    %cst_17 = arith.constant 0.000000e+00 : f32
    %27 = vector.broadcast %cst_17 : f32 to vector<16x8xf32>
    %28 = arith.cmpf ogt, %26, %27 : vector<16x8xf32>
    %cst_18 = arith.constant 1.000000e+00 : f32
    %29 = vector.broadcast %cst_18 : f32 to vector<16x8xf32>
    %30 = arith.mulf %29, %26 : vector<16x8xf32>
    %cst_19 = arith.constant 0.000000e+00 : f32
    %31 = vector.broadcast %cst_19 : f32 to vector<16x8xf32>
    %32 = arith.select %28, %30, %31 : vector<16x8xi1>, vector<16x8xf32>
    %cst_20 = arith.constant dense<0.000000e+00> : vector<16x8xf32>
    %33 = tpu.matmul %13, %32, %cst_20 {dimension_numbers = #tpu.dot_dimension_numbers<[1], [0], [0], [1], [0, 0, 1, 1], [], []>} : vector<16x16xf32>, vector<16x8xf32>, vector<16x8xf32> -> vector<16x8xf32>
    %34 = arith.addf %33, %16 : vector<16x8xf32>
    %cst_21 = arith.constant 0.000000e+00 : f32
    %35 = vector.broadcast %cst_21 : f32 to vector<16x8xf32>
    %36 = arith.cmpf ogt, %34, %35 : vector<16x8xf32>
    %cst_22 = arith.constant 1.000000e+00 : f32
    %37 = vector.broadcast %cst_22 : f32 to vector<16x8xf32>
    %38 = arith.mulf %37, %34 : vector<16x8xf32>
    %cst_23 = arith.constant 0.000000e+00 : f32
    %39 = vector.broadcast %cst_23 : f32 to vector<16x8xf32>
    %40 = arith.select %36, %38, %39 : vector<16x8xi1>, vector<16x8xf32>
    %c0_24 = arith.constant 0 : index
    %c0_25 = arith.constant 0 : index
    %41 = vector.load %arg6[%c0_24, %c0_25] : memref<1x16xf32, #tpu.memory_space<vmem>>, vector<1x16xf32>
    %cst_26 = arith.constant dense<0.000000e+00> : vector<1x8xf32>
    %42 = tpu.matmul %41, %40, %cst_26 {dimension_numbers = #tpu.dot_dimension_numbers<[1], [0], [0], [1], [0, 0, 1, 1], [], []>} : vector<1x16xf32>, vector<16x8xf32>, vector<1x8xf32> -> vector<1x8xf32>
    %c0_27 = arith.constant 0 : index
    %c0_28 = arith.constant 0 : index
    %43 = memref.load %arg7[%c0_27, %c0_28] : memref<1x1xf32, #tpu.memory_space<smem>>
    %44 = vector.broadcast %43 : f32 to vector<1x8xf32>
    %45 = arith.addf %42, %44 : vector<1x8xf32>
    %46 = arith.negf %45 : vector<1x8xf32>
    %47 = math.exp %46 : vector<1x8xf32>
    %cst_29 = arith.constant 1.000000e+00 : f32
    %48 = vector.broadcast %cst_29 : f32 to vector<1x8xf32>
    %49 = arith.addf %48, %47 : vector<1x8xf32>
    %50 = arith.divf %48, %49 : vector<1x8xf32>
    %c0_30 = arith.constant 0 : index
    %c0_31 = arith.constant 0 : index
    %51 = vector.load %arg8[%c0_30, %c0_31] : memref<1x8xf32, #tpu.memory_space<vmem>>, vector<1x8xf32>
    tpu.vector_store %arg8[%c0_30, %c0_31], %50 {strides = array<i32>} : memref<1x8xf32, #tpu.memory_space<vmem>>, vector<1x8xf32>,
    return
  }
  func.func @transform_0(%arg0: i32) -> (i32, i32) {
    %c0_i32 = arith.constant 0 : i32
    %c0_i32_0 = arith.constant 0 : i32
    return %c0_i32, %arg0 : i32, i32
  }
  func.func @transform_1(%arg0: i32) -> (i32, i32) {
    %c0_i32 = arith.constant 0 : i32
    %c0_i32_0 = arith.constant 0 : i32
    %c0_i32_1 = arith.constant 0 : i32
    return %c0_i32, %c0_i32_0 : i32, i32
  }
  func.func @transform_2(%arg0: i32) -> (i32, i32) {
    %c0_i32 = arith.constant 0 : i32
    %c0_i32_0 = arith.constant 0 : i32
    %c0_i32_1 = arith.constant 0 : i32
    return %c0_i32, %c0_i32_0 : i32, i32
  }
  func.func @transform_3(%arg0: i32) -> (i32, i32) {
    %c0_i32 = arith.constant 0 : i32
    %c0_i32_0 = arith.constant 0 : i32
    %c0_i32_1 = arith.constant 0 : i32
    return %c0_i32, %c0_i32_0 : i32, i32
  }
  func.func @transform_4(%arg0: i32) -> (i32, i32) {
    %c0_i32 = arith.constant 0 : i32
    %c0_i32_0 = arith.constant 0 : i32
    %c0_i32_1 = arith.constant 0 : i32
    return %c0_i32, %c0_i32_0 : i32, i32
  }
  func.func @transform_5(%arg0: i32) -> (i32, i32) {
    %c0_i32 = arith.constant 0 : i32
    %c0_i32_0 = arith.constant 0 : i32
    %c0_i32_1 = arith.constant 0 : i32
    return %c0_i32, %c0_i32_0 : i32, i32
  }
  func.func @transform_6(%arg0: i32) -> (i32, i32) {
    %c0_i32 = arith.constant 0 : i32
    %c0_i32_0 = arith.constant 0 : i32
    %c0_i32_1 = arith.constant 0 : i32
    return %c0_i32, %c0_i32_0 : i32, i32
  }
  func.func @transform_7(%arg0: i32) -> (i32, i32) {
    %c0_i32 = arith.constant 0 : i32
    %c0_i32_0 = arith.constant 0 : i32
    return %c0_i32, %arg0 : i32, i32
  }
}

</mosaic_0001>

<bundles_post_ra>
// kernel: complex_nn_1_forward.1
= control target key start
LH: loop header
LB: loop body
LE: loop exit
PB: predicated region body
PF: predicated region fallthrough
CT: control target
= control target key end

     0   :  { %vm46_vm0 = vcmask 261120   ;;  %v631_v6 = vmov 0   ;;  %s739_s0 = inlined_call_operand.vmem [shape: f32[32,8], index: 0, kind: input, shape index: {}]   ;;  %s740_s1 = inlined_call_operand.vmem [shape: f32[16,32], index: 1, kind: input, shape index: {}]   ;;  %s741_s2 = inlined_call_operand.vmem [shape: f32[16,1], index: 2, kind: input, shape index: {}]   ;;  %s742_s3 = inlined_call_operand.vmem [shape: f32[16,16], index: 3, kind: input, shape index: {}]   ;;  %s743_s4 = inlined_call_operand.vmem [shape: f32[16,1], index: 4, kind: input, shape index: {}]   ;;  %s744_s5 = inlined_call_operand.vmem [shape: f32[1,16], index: 5, kind: input, shape index: {}]   ;;  %s745_s6 = inlined_call_operand.<no memory space> [shape: f32[1,1], index: 6, kind: input, shape index: {}]   ;;  %s746_s7 = inlined_call_operand.hbm [shape: f32[1,8], index: 7, kind: output, shape index: {}]  }
   0x1   :  { %v28_v0 = vld [vmem:[%s739_s0] sm:$0xff]  ;;  %v29_v1 = vld [vmem:[%s739_s0 + $0x8] sm:$0xff]  ;;  %v30_v2 = vld [vmem:[%s739_s0 + $0x10] sm:$0xff]  ;;  %601 = vset.pattern.permute.xlu0 %v631_v6  ;;  %602 = vset.pattern.permute.xlu1 %v631_v6 }
   0x2   :  { %v566_v3 = vpack.c.bf16 %v29_v1, %v28_v0  ;;  %v31_v4 = vld [vmem:[%s739_s0 + $0x18] sm:$0xff]  ;;  %v32_v5 = vld [vmem:[%s740_s1] sm:$0xff] }
   0x3   :  { %v570_v7 = vpack.c.bf16 %v31_v4, %v30_v2  ;;  %535 = vmatprep.mubr.msk.f32.mxu0 %vm46_vm0, %v32_v5  ;;  %v34_v8 = vld [vmem:[%s741_s2] sm:$0xff] }
   0x4   :  { %13 = vsyncpa [#allocation4], 0  ;;  %567 = vmatprep.subr.bf16.mxu0 %v566_v3  ;;  %38 = vperm.xlu0 %601, %v34_v8   ;;  %v35_v9 = vld [vmem:[%s741_s2 + $0x8] sm:$0xff]  ;;  %v132_v11 = vld [vmem:[%s742_s3] sm:$0xff]  ;;  %vm146_vm1 = vcmask 130048   ;;  %v632_v34 = vmov 0.0|0.0   ;;  %v392_v42 = vstv %s745_s6 }
   0x5   :  { %569 = vmatpush3.bf16.msra.mxu0 %v566_v3  ;;  %v33_v10 = vld [vmem:[%s740_s1 + $0x8] sm:$0xff]  ;;  %542 = vmatprep.mubr.msk.f32.mxu1 %vm146_vm1, %v132_v11  ;;  %v134_v12 = vld [vmem:[%s743_s4] sm:$0xff]  ;;  %vm633_vm11 = vmmov 0   ;;  %v634_v35 = vmov 0.0   ;;  %s635_s24 = smov [#allocation3]   ;;  %vm472_vm15 = vcmask 57344  }
   0x6   :  { %571 = vmatprep.subr.bf16.mxu0 %v570_v7  ;;  %138 = vperm.xlu1 %602, %v134_v12   ;;  %v135_v13 = vld [vmem:[%s743_s4 + $0x8] sm:$0xff]  ;;  %v390_v41 = vld [vmem:[%s744_s5] sm:$0x1]  ;;  %s480_s25 = sshll.u32 %s635_s24, 4  ;;  %s481_s25 = int_to_ptr.vmem [resolvable:$true] %s480_s25 }
   0x7   :  { %v133_v21 = vld [vmem:[%s742_s3 + $0x8] sm:$0xff]  ;;  %s607_s5 = scalar_lea.vmem %s481_s25, 16  ;;  %s611_s26 = scalar_lea.vmem %s481_s25, 32 }
   0x8   :  { %43 = vperm.xlu0 %601, %v35_v9   ;;  %p608_p0 = scmp.ne.s32.totalorder %s481_s25, %s607_s5  ;;  %p612_p1 = scmp.lt.s32.totalorder %s481_s25, %s481_s25 }
   0x9   :  { %573 = vmatpush3.bf16.msra.mxu0 %v570_v7  ;;  %p613_p2 = scmp.lt.s32.totalorder %s611_s26, %s607_s5 }
   0xa   :  { %143 = vperm.xlu1 %602, %v135_v13  }
   0xb   :  { %p614_p3 = por %p613_p2, %p612_p1 }
   0xc   :  { %536 = vmatmul.mubr.msk.f32.vlgmr.msra.gmra.mrb[0].mxu0 %vm46_vm0, %v33_v10 }
   0xd   :  { %556 = vmatprep.mubr.msk.f32.mxu0 %vm146_vm1, %v132_v11  ;;  %p615_p4 = pnand %p614_p3, %p608_p0 }
  0x83   :  { %v39_v14 = vpop.permute.xlu0 %38 }
  0x85   :  { %v139_v22 = vpop.permute.xlu1 %138 }
  0x87   :  { %v44_v15 = vpop.permute.xlu0 %43 }
  0x89   :  { %v144_v23 = vpop.permute.xlu1 %143 }
  0xdf   :  { %v537_v16 = vpop.f32.mrb[0].mxu0 }
  0xe0   :  { %v125_v17 = vadd.f32 %v537_v16, %v44_v15  ;;  %v119_v18 = vpop.f32.mrb[1].mxu0 }
  0xe1   :  { %v120_v19 = vadd.f32 %v119_v18, %v39_v14 }
  0xe2   :  { %vm129_vm2 = vcmp.gt.f32.partialorder %v125_v17, 0.0 }
  0xe3   :  { %vm128_vm3 = vcmp.gt.f32.partialorder %v120_v19, 0.0  ;;  %v574_v20 = vpack.c.bf16 %v125_v17, %v120_v19 }
  0xe4   :  { %vm575_vm4 = vmpackc.low %vm129_vm2, %vm128_vm3 }
  0xe5   :  { %576 = vmatprep.subr.msk.bf16.mxu1 %vm575_vm4, %v574_v20 }
  0xe6   :  { %579 = vmatpush3.bf16.msk.msra.mxu1 %vm575_vm4, %v574_v20 }
  0xe9   :  { %543 = vmatmul.mubr.msk.f32.vlgmr.msra.gmra.mrb[0].mxu1 %vm146_vm1, %v133_v21 }
  0xea   :  { %549 = vmatprep.mubr.msk.f32.mxu1 %vm146_vm1, %v132_v11 }
 0x1bc   :  { %v544_v24 = vpop.f32.mrb[0].mxu1 }
 0x1bd   :  { %v225_v25 = vadd.f32 %v544_v24, %v144_v23  ;;  %v219_v26 = vpop.f32.mrb[1].mxu1 }
 0x1be   :  { %v220_v27 = vadd.f32 %v219_v26, %v139_v22 }
 0x1bf   :  { %vm229_vm5 = vcmp.gt.f32.partialorder %v225_v25, 0.0 }
 0x1c0   :  { %vm228_vm6 = vcmp.gt.f32.partialorder %v220_v27, 0.0  ;;  %v580_v28 = vpack.c.bf16 %v225_v25, %v220_v27 }
 0x1c1   :  { %vm581_vm7 = vmpackc.low %vm229_vm5, %vm228_vm6 }
 0x1c2   :  { %582 = vmatprep.subr.msk.bf16.mxu1 %vm581_vm7, %v580_v28 }
 0x1c3   :  { %585 = vmatpush3.bf16.msk.msra.mxu1 %vm581_vm7, %v580_v28 }
 0x1c4   :  { %592 = vmatprep.subr.bf16.mxu1 %v632_v34 }
 0x1c6   :  { %550 = vmatmul.mubr.msk.f32.vlgmr.msra.gmra.mrb[2].mxu1 %vm146_vm1, %v133_v21 }
 0x1c7   :  { %563 = vmatprep.mubr.msk.f32.mxu1 %vm633_vm11, %v634_v35 }
 0x299   :  { %v551_v29 = vpop.f32.mrb[2].mxu1 }
 0x29a   :  { %v304_v30 = vadd.f32 %v551_v29, %v144_v23  ;;  %v298_v31 = vpop.f32.mrb[3].mxu1 }
 0x29b   :  { %v299_v32 = vadd.f32 %v298_v31, %v139_v22 }
 0x29c   :  { %vm308_vm8 = vcmp.gt.f32.partialorder %v304_v30, 0.0 }
 0x29d   :  { %vm307_vm9 = vcmp.gt.f32.partialorder %v299_v32, 0.0  ;;  %v586_v33 = vpack.c.bf16 %v304_v30, %v299_v32 }
 0x29e   :  { %vm587_vm10 = vmpackc.low %vm308_vm8, %vm307_vm9 }
 0x29f   :  { %588 = vmatprep.subr.msk.bf16.mxu0 %vm587_vm10, %v586_v33 }
 0x2a0   :  { %591 = vmatpush3.bf16.msk.msra.mxu0 %vm587_vm10, %v586_v33 }
 0x2a3   :  { %557 = vmatmul.mubr.msk.f32.vlgmr.msra.gmra.mrb[2].mxu0 %vm146_vm1, %v133_v21 }
 0x376   :  { %v558_v36 = vpop.f32.mrb[2].mxu0 }
 0x377   :  { %v383_v37 = vadd.f32 %v558_v36, %v144_v23  ;;  %v377_v38 = vpop.f32.mrb[3].mxu0 }
 0x378   :  { %v378_v39 = vadd.f32 %v377_v38, %v139_v22 }
 0x379   :  { %vm387_vm12 = vcmp.gt.f32.partialorder %v383_v37, 0.0 }
 0x37a   :  { %vm386_vm13 = vcmp.gt.f32.partialorder %v378_v39, 0.0  ;;  %v593_v40 = vpack.c.bf16 %v383_v37, %v378_v39 }
 0x37b   :  { %vm594_vm14 = vmpackc.low %vm387_vm12, %vm386_vm13 }
 0x37c   :  { %595 = vmatpush3.bf16.msk.msra.mxu1 %vm594_vm14, %v593_v40 }
 0x37f   :  { %564 = vmatmul.mubr.msk.f32.vlgmr.msra.gmra.mrb[4].mxu1 %vm146_vm1, %v390_v41 }
 0x452   :  { %v462_v43 = vpop.f32.mrb[4].mxu1 }
 0x453   :  { %v463_v44 = vadd.f32 %v462_v43, %v392_v42  ;;  %v565_v45 = vpop.f32.mrb[5].mxu1 }
 0x455   :  { %v505_v46 = vmul.f32 -1.442695, %v463_v44 }
 0x457   :  { %603 = vpow2.f32 %v505_v46 }
 0x461   :  { %v604_v47 = vpop.eup %603 }
 0x462   :  { %v469_v48 = vadd.f32 1.0, %v604_v47 }
 0x464   :  { %605 = vrcp.f32 %v469_v48 }
 0x46e   :  { %v606_v49 = vpop.eup %605 }
 0x46f   :  { %473 = vst.msk [vmem:[#allocation3] sm:$0x1] %vm472_vm15, %v606_v49 }
 0x470   :  { %618 = shalt.err (!%p615_p4)
}
 0x471   :  { %s619_s28 = scalar_lea.hbm %s746_s7, 16 }
 0x472   :  { %p620_p5 = scmp.ne.s32.totalorder %s746_s7, %s619_s28  ;;  %p623_p6 = scmp.lt.u32.totalorder %s619_s28, %s746_s7 }
 0x474   :  { %p625_p7 = pnand %p623_p6, %p620_p5 }
 0x476   :  { %628 = shalt.err (!%p625_p7)
}
 0x477   :  { %483 = dma.vmem_to_hbm [thread:$0]  %s481_s25, 16, %s746_s7, [#allocation4]  }
 0x478   :  { %629 = dma.done.wait [#allocation4], 16  }
 0x479   :  { %630 = vsyncadd [#allocation4], 4294967280 }
 0x47a   :  { %487 = vsyncpa [#allocation4], 1 }

</bundles_post_ra>
